<compile_context>
chip_gen: v7x
topology: tpu7x:2x2x1
jax: 0.10.0
libtpu: 0.0.40
codegen_flags: <defaults>
</compile_context>

<pallas_src>
import jax
import jax.numpy as jnp
from jax.experimental import pallas as pl
from jax.experimental.pallas import tpu as pltpu


IN_DIM = 178
HID_DIM = 16
OUT_DIM = 5
DEFAULT_BLOCK_B = 4096  # rows of x per grid step (multiple of 8)


def _round_up(n, m):
    return ((n + m - 1) // m) * m


def _mlp_kernel(x_ref, w1_ref, b1_ref, w2_ref, b2_ref, o_ref):
    # hidden = sigmoid(x @ W1 + b1); MXU accumulates in f32 even for bf16 inputs.
    h = jnp.dot(x_ref[...], w1_ref[...], preferred_element_type=jnp.float32)
    h = jax.nn.sigmoid(h + b1_ref[...])        # (TB, 16) + (1, 16), f32 (EUP sigmoid)
    # out = hidden @ W2 + b2 (tiny N; HBM/DMA is the binding resource, not MXU)
    y = jnp.dot(h, w2_ref[...], preferred_element_type=jnp.float32)
    o_ref[...] = (y + b2_ref[...]).astype(o_ref.dtype)


def my_mlp_forward(x, w1, b1, w2, b2, *, block_b=DEFAULT_BLOCK_B,
                   vmem_limit_bytes=None):
    """x: (B, 178) float32 or bfloat16. Returns (B, 5) float32.

    x is streamed in its stored dtype (store it as bf16 upstream to halve the
    dominant HBM read). block_b is the batch tile size (rounded to a multiple
    of 8 and clamped for megacore / VMEM limits).
    """
    B = x.shape[0]
    assert x.shape[1] == IN_DIM

    # Only the tiny W1 is cast to match x's streamed dtype; b1/w2/b2 stay f32
    # and feed the f32 epilogue.
    if w1.dtype != x.dtype:
        w1 = w1.astype(x.dtype)

    # Batch tile: multiple of 8 (sublane rule), at most block_b, and split so
    # the grid has >= 2 steps whenever B > 8 (so v7x's two TensorCores both
    # get work via the "parallel" axis; no-op on single-TC v5e/v6e).
    tb = _round_up(min(block_b, B), 8)
    if B > 8:
        tb = min(tb, _round_up(pl.cdiv(B, 2), 8))

    # VMEM budgeting with lane padding: the x block occupies tb x 256 lanes in
    # VMEM (178 pads to 2 lane tiles) and the (tb, 5) out block lane-pads to
    # tb x 128, each double-buffered. Cap the footprint at ~24 MiB (v7x-safe).
    lane_k = _round_up(IN_DIM, 128)                       # 256
    per_row_bytes = lane_k * x.dtype.itemsize + 128 * 4   # x buf + out buf per row
    max_tb = max(8, ((24 << 20) // (2 * per_row_bytes)) // 8 * 8)
    tb = max(8, min(tb, max_tb))

    grid = (pl.cdiv(B, tb),)   # ragged last block: no pad copy, writeback clips

    if vmem_limit_bytes is None:
        est = 2 * tb * per_row_bytes + (2 << 20)          # + weights/headroom
        if est > (12 << 20):                              # past v5e's 16 MiB default
            vmem_limit_bytes = 32 << 20

    # Advisory cost estimate (mem-bound: the x read dominates).
    x_bytes = B * IN_DIM * x.dtype.itemsize
    w_bytes = (w1.size * w1.dtype.itemsize + b1.size * b1.dtype.itemsize
               + w2.size * w2.dtype.itemsize + b2.size * b2.dtype.itemsize)
    out_bytes = B * OUT_DIM * 4
    cost = pl.CostEstimate(
        flops=2 * B * (IN_DIM * HID_DIM + HID_DIM * OUT_DIM),
        transcendentals=B * HID_DIM,           # sigmoid
        bytes_accessed=x_bytes + w_bytes + out_bytes,
    )

    return pl.pallas_call(
        _mlp_kernel,
        out_shape=jax.ShapeDtypeStruct((B, OUT_DIM), jnp.float32),
        grid=grid,
        in_specs=[
            pl.BlockSpec((tb, IN_DIM), lambda i: (i, 0)),       # streamed per tile
            pl.BlockSpec((IN_DIM, HID_DIM), lambda i: (0, 0)),  # resident in VMEM
            pl.BlockSpec((1, HID_DIM), lambda i: (0, 0)),
            pl.BlockSpec((HID_DIM, OUT_DIM), lambda i: (0, 0)),
            pl.BlockSpec((1, OUT_DIM), lambda i: (0, 0)),
        ],
        out_specs=pl.BlockSpec((tb, OUT_DIM), lambda i: (i, 0)),
        compiler_params=pltpu.CompilerParams(
            dimension_semantics=("parallel",),   # megacore sharding on v7x
            vmem_limit_bytes=vmem_limit_bytes,
        ),
        cost_estimate=cost,
    )(x, w1, b1, w2, b2)


def init_params(key):
    """Deterministic init mimicking nn.Linear's uniform(-1/sqrt(fan_in), 1/sqrt(fan_in)).

    Weights are stored as (in_features, out_features) == PyTorch weight.T.
    """
    k1, k2, k3, k4 = jax.random.split(key, 4)
    bound1 = 1.0 / jnp.sqrt(jnp.float32(IN_DIM))
    bound2 = 1.0 / jnp.sqrt(jnp.float32(HID_DIM))
    w1 = jax.random.uniform(k1, (IN_DIM, HID_DIM), jnp.float32, -bound1, bound1)
    b1 = jax.random.uniform(k2, (1, HID_DIM), jnp.float32, -bound1, bound1)
    w2 = jax.random.uniform(k3, (HID_DIM, OUT_DIM), jnp.float32, -bound2, bound2)
    b2 = jax.random.uniform(k4, (1, OUT_DIM), jnp.float32, -bound2, bound2)
    return w1, b1, w2, b2


def reference_forward(x, w1, b1, w2, b2):
    h = jax.nn.sigmoid(x.astype(jnp.float32) @ w1 + b1)
    return h @ w2 + b2


if __name__ == "__main__":
    key = jax.random.PRNGKey(0)
    kx, kp = jax.random.split(key)
    w1, b1, w2, b2 = init_params(kp)

    # Small batch: single grid step.
    B = 8
    x = jax.random.normal(kx, (B, IN_DIM), jnp.float32)
    out = jax.block_until_ready(my_mlp_forward(x, w1, b1, w2, b2))
    ref = reference_forward(x, w1, b1, w2, b2)
    assert out.shape == (B, OUT_DIM)
    assert jnp.allclose(out, ref, atol=1e-5, rtol=1e-5)

    # Ragged, multi-step pipeline: B=300 with a 64-row tile -> grid=(5,); the
    # last block covers only 44 valid rows (no pad copy; writeback is clipped).
    B2 = 300
    x2 = jax.random.normal(kx, (B2, IN_DIM), jnp.float32)
    out2 = jax.block_until_ready(my_mlp_forward(x2, w1, b1, w2, b2, block_b=64))
    ref2 = reference_forward(x2, w1, b1, w2, b2)
    assert out2.shape == (B2, OUT_DIM)
    assert jnp.allclose(out2, ref2, atol=1e-5, rtol=1e-5)

    # Default tiling on the same ragged batch: grid splits into 2 steps so the
    # batch axis spans both TensorCores on v7x.
    out2b = jax.block_until_ready(my_mlp_forward(x2, w1, b1, w2, b2))
    assert jnp.allclose(out2b, ref2, atol=1e-5, rtol=1e-5)

    # bf16-streamed path: caller stores x as bf16 (no wrapper-side cast pass),
    # halving the dominant HBM read; MXU still accumulates in f32.
    x2_bf16 = x2.astype(jnp.bfloat16)
    out3 = jax.block_until_ready(my_mlp_forward(x2_bf16, w1, b1, w2, b2))
    assert out3.shape == (B2, OUT_DIM)
    assert jnp.allclose(out3, ref2, atol=5e-2, rtol=5e-2)

    print("KERNEL_OK")
</pallas_src>

<mosaic_0001>
module attributes {stable_mosaic.version = 11 : i64} {
  func.func @_mlp_kernel(%arg0: i32, %arg1: memref<8x178xf32, #tpu.memory_space<vmem>>, %arg2: memref<178x16xf32, #tpu.memory_space<vmem>>, %arg3: memref<1x16xf32, #tpu.memory_space<vmem>>, %arg4: memref<16x5xf32, #tpu.memory_space<vmem>>, %arg5: memref<1x5xf32, #tpu.memory_space<vmem>>, %arg6: memref<8x5xf32, #tpu.memory_space<vmem>>) attributes {dimension_semantics = [#tpu.dimension_semantics<parallel>], iteration_bounds = array<i64: 1>, scalar_prefetch = 0 : i64, scratch_operands = 0 : i64, tpu.core_type = #tpu.core_type<tc>, window_params = [{transform_indices = @transform_0, window_bounds = array<i64: 8, 178>}, {pipeline_mode = #tpu.pipeline_mode<synchronous>, transform_indices = @transform_1, window_bounds = array<i64: 178, 16>}, {pipeline_mode = #tpu.pipeline_mode<synchronous>, transform_indices = @transform_2, window_bounds = array<i64: 1, 16>}, {pipeline_mode = #tpu.pipeline_mode<synchronous>, transform_indices = @transform_3, window_bounds = array<i64: 16, 5>}, {pipeline_mode = #tpu.pipeline_mode<synchronous>, transform_indices = @transform_4, window_bounds = array<i64: 1, 5>}, {transform_indices = @transform_5, window_bounds = array<i64: 8, 5>}]} {
    %c0 = arith.constant 0 : index
    %c0_0 = arith.constant 0 : index
    %0 = vector.load %arg1[%c0, %c0_0] : memref<8x178xf32, #tpu.memory_space<vmem>>, vector<8x178xf32>
    %c0_1 = arith.constant 0 : index
    %c0_2 = arith.constant 0 : index
    %1 = vector.load %arg2[%c0_1, %c0_2] : memref<178x16xf32, #tpu.memory_space<vmem>>, vector<178x16xf32>
    %cst = arith.constant dense<0.000000e+00> : vector<8x16xf32>
    %2 = tpu.matmul %0, %1, %cst {dimension_numbers = #tpu.dot_dimension_numbers<[1], [0], [0], [1], [0, 0, 1, 1], [], []>} : vector<8x178xf32>, vector<178x16xf32>, vector<8x16xf32> -> vector<8x16xf32>
    %c0_3 = arith.constant 0 : index
    %c0_4 = arith.constant 0 : index
    %3 = vector.load %arg3[%c0_3, %c0_4] : memref<1x16xf32, #tpu.memory_space<vmem>>, vector<1x16xf32>
    %4 = vector.broadcast %3 : vector<1x16xf32> to vector<8x16xf32>
    %5 = arith.addf %2, %4 : vector<8x16xf32>
    %6 = arith.negf %5 : vector<8x16xf32>
    %7 = math.exp %6 : vector<8x16xf32>
    %cst_5 = arith.constant 1.000000e+00 : f32
    %8 = vector.broadcast %cst_5 : f32 to vector<8x16xf32>
    %9 = arith.addf %8, %7 : vector<8x16xf32>
    %10 = arith.divf %8, %9 : vector<8x16xf32>
    %c0_6 = arith.constant 0 : index
    %c0_7 = arith.constant 0 : index
    %11 = vector.load %arg4[%c0_6, %c0_7] : memref<16x5xf32, #tpu.memory_space<vmem>>, vector<16x5xf32>
    %cst_8 = arith.constant dense<0.000000e+00> : vector<8x5xf32>
    %12 = tpu.matmul %10, %11, %cst_8 {dimension_numbers = #tpu.dot_dimension_numbers<[1], [0], [0], [1], [0, 0, 1, 1], [], []>} : vector<8x16xf32>, vector<16x5xf32>, vector<8x5xf32> -> vector<8x5xf32>
    %c0_9 = arith.constant 0 : index
    %c0_10 = arith.constant 0 : index
    %13 = vector.load %arg5[%c0_9, %c0_10] : memref<1x5xf32, #tpu.memory_space<vmem>>, vector<1x5xf32>
    %14 = vector.broadcast %13 : vector<1x5xf32> to vector<8x5xf32>
    %15 = arith.addf %12, %14 : vector<8x5xf32>
    %c0_11 = arith.constant 0 : index
    %c0_12 = arith.constant 0 : index
    %16 = vector.load %arg6[%c0_11, %c0_12] : memref<8x5xf32, #tpu.memory_space<vmem>>, vector<8x5xf32>
    tpu.vector_store %arg6[%c0_11, %c0_12], %15 {strides = array<i32>} : memref<8x5xf32, #tpu.memory_space<vmem>>, vector<8x5xf32>,
    return
  }
  func.func @transform_0(%arg0: i32) -> (i32, i32) {
    %c0_i32 = arith.constant 0 : i32
    %c0_i32_0 = arith.constant 0 : i32
    return %arg0, %c0_i32 : i32, i32
  }
  func.func @transform_1(%arg0: i32) -> (i32, i32) {
    %c0_i32 = arith.constant 0 : i32
    %c0_i32_0 = arith.constant 0 : i32
    %c0_i32_1 = arith.constant 0 : i32
    return %c0_i32, %c0_i32_0 : i32, i32
  }
  func.func @transform_2(%arg0: i32) -> (i32, i32) {
    %c0_i32 = arith.constant 0 : i32
    %c0_i32_0 = arith.constant 0 : i32
    %c0_i32_1 = arith.constant 0 : i32
    return %c0_i32, %c0_i32_0 : i32, i32
  }
  func.func @transform_3(%arg0: i32) -> (i32, i32) {
    %c0_i32 = arith.constant 0 : i32
    %c0_i32_0 = arith.constant 0 : i32
    %c0_i32_1 = arith.constant 0 : i32
    return %c0_i32, %c0_i32_0 : i32, i32
  }
  func.func @transform_4(%arg0: i32) -> (i32, i32) {
    %c0_i32 = arith.constant 0 : i32
    %c0_i32_0 = arith.constant 0 : i32
    %c0_i32_1 = arith.constant 0 : i32
    return %c0_i32, %c0_i32_0 : i32, i32
  }
  func.func @transform_5(%arg0: i32) -> (i32, i32) {
    %c0_i32 = arith.constant 0 : i32
    %c0_i32_0 = arith.constant 0 : i32
    return %arg0, %c0_i32 : i32, i32
  }
}

</mosaic_0001>

<bundles_post_ra>
// kernel: tpu_custom_call.1
= control target key start
LH: loop header
LB: loop body
LE: loop exit
PB: predicated region body
PF: predicated region fallthrough
CT: control target
= control target key end

     0   :  { %v320_v3 = vmov 0.0|0.0   ;;  %vm53_vm0 = vcmask 408576   ;;  %s453_s0 = inlined_call_operand.vmem [shape: f32[8,178], index: 0, kind: input, shape index: {}]   ;;  %s454_s1 = inlined_call_operand.vmem [shape: f32[178,16], index: 1, kind: input, shape index: {}]   ;;  %s455_s2 = inlined_call_operand.vmem [shape: f32[1,16], index: 2, kind: input, shape index: {}]   ;;  %s456_s3 = inlined_call_operand.vmem [shape: f32[16,5], index: 3, kind: input, shape index: {}]   ;;  %s457_s4 = inlined_call_operand.vmem [shape: f32[1,5], index: 4, kind: input, shape index: {}]   ;;  %s458_s5 = inlined_call_operand.hbm [shape: f32[8,5], index: 5, kind: output, shape index: {}]  }
   0x1   :  { %v23_v0 = vld [vmem:[%s454_s1] sm:$0xff]  ;;  %v24_v1 = vld [vmem:[%s454_s1 + $0x8] sm:$0xff]  ;;  %v25_v2 = vld [vmem:[%s454_s1 + $0x10] sm:$0xff]  ;;  %252 = vmatprep.subr.bf16.mxu0 %v320_v3  ;;  %285 = vmatprep.subr.bf16.mxu1 %v320_v3 }
   0x2   :  { %v253_v4 = vpack.c.bf16 %v24_v1, %v23_v0  ;;  %v26_v5 = vld [vmem:[%s454_s1 + $0x18] sm:$0xff]  ;;  %v27_v7 = vld [vmem:[%s454_s1 + $0x20] sm:$0xff]  ;;  %v28_v8 = vld [vmem:[%s454_s1 + $0x28] sm:$0xff] }
   0x3   :  { %v256_v6 = vpack.c.bf16 %v26_v5, %v25_v2  ;;  %v259_v9 = vpack.c.bf16 %v28_v8, %v27_v7  ;;  %v22_v10 = vld [vmem:[%s453_s0 + $0x8] sm:$0xff]  ;;  %v29_v11 = vld [vmem:[%s454_s1 + $0x30] sm:$0xff]  ;;  %v30_v12 = vld [vmem:[%s454_s1 + $0x38] sm:$0xff] }
   0x4   :  { %254 = vmatpush1.bf16.msra.mxu0 %v253_v4  ;;  %238 = vmatprep.mubr.msk.f32.mxu0 %vm53_vm0, %v22_v10 }
   0x5   :  { %255 = vmatprep.subr.bf16.mxu0 %v320_v3 }
   0x8   :  { %257 = vmatpush1.bf16.msra.mxu0 %v256_v6 }
   0x9   :  { %258 = vmatprep.subr.bf16.mxu0 %v320_v3 }
   0xa   :  { %10 = vsyncpa [#allocation3], 0  ;;  %v262_v13 = vpack.c.bf16 %v30_v12, %v29_v11  ;;  %v31_v14 = vld [vmem:[%s454_s1 + $0x40] sm:$0xff]  ;;  %v32_v15 = vld [vmem:[%s454_s1 + $0x48] sm:$0xff]  ;;  %v321_v35 = vmov 0.0   ;;  %vm57_vm1 = vcmask 1041408  }
   0xb   :  { %v265_v16 = vpack.c.bf16 %v32_v15, %v31_v14  ;;  %v33_v17 = vld [vmem:[%s454_s1 + $0x50] sm:$0xff]  ;;  %v34_v18 = vld [vmem:[%s454_s1 + $0x58] sm:$0xff]  ;;  %v35_v20 = vld [vmem:[%s454_s1 + $0x60] sm:$0xff]  ;;  %vm322_vm2 = vmmov 0   ;;  %vm146_vm3 = vcmask 130048   ;;  %s323_s23 = smov [#allocation2]  }
   0xc   :  { %260 = vmatpush1.bf16.msra.mxu0 %v259_v9  ;;  %v268_v19 = vpack.c.bf16 %v34_v18, %v33_v17  ;;  %v36_v21 = vld [vmem:[%s454_s1 + $0x68] sm:$0xff]  ;;  %v37_v23 = vld [vmem:[%s454_s1 + $0x70] sm:$0xff]  ;;  %v38_v24 = vld [vmem:[%s454_s1 + $0x78] sm:$0xff]  ;;  %249 = vmatprep.mubr.msk.f32.mxu1 %vm322_vm2, %v321_v35  ;;  %s228_s24 = sshll.u32 %s323_s23, 4  ;;  %vm220_vm4 = vcmask 39936   ;;  %s229_s24 = int_to_ptr.vmem [resolvable:$true] %s228_s24 }
   0xd   :  { %261 = vmatprep.subr.bf16.mxu0 %v320_v3  ;;  %v271_v22 = vpack.c.bf16 %v36_v21, %v35_v20  ;;  %v274_v25 = vpack.c.bf16 %v38_v24, %v37_v23  ;;  %v39_v26 = vld [vmem:[%s454_s1 + $0x80] sm:$0xff]  ;;  %v40_v27 = vld [vmem:[%s454_s1 + $0x88] sm:$0xff]  ;;  %v41_v29 = vld [vmem:[%s454_s1 + $0x90] sm:$0xff]  ;;  %p301_p1 = scmp.lt.s32.totalorder %s229_s24, %s229_s24 }
   0xe   :  { %v277_v28 = vpack.c.bf16 %v40_v27, %v39_v26  ;;  %v42_v30 = vld [vmem:[%s454_s1 + $0x98] sm:$0xff]  ;;  %v43_v32 = vld [vmem:[%s454_s1 + $0xa0] sm:$0xff]  ;;  %v44_v33 = vld [vmem:[%s454_s1 + $0xa8] sm:$0xff] }
   0xf   :  { %v280_v31 = vpack.c.bf16 %v42_v30, %v41_v29  ;;  %v283_v34 = vpack.c.bf16 %v44_v33, %v43_v32  ;;  %v45_v36 = vld [vmem:[%s454_s1 + $0xb0] sm:$0x3]  ;;  %v21_v37 = vld [vmem:[%s453_s0] sm:$0xff]  ;;  %v138_v39 = vld [vmem:[%s456_s3 + $0x8] sm:$0xff] }
  0x10   :  { %263 = vmatpush1.bf16.msra.mxu0 %v262_v13  ;;  %v137_v38 = vld [vmem:[%s456_s3] sm:$0xff] }
  0x11   :  { %264 = vmatprep.subr.bf16.mxu0 %v320_v3  ;;  %v286_v40 = vpack.c.bf16 %v138_v39, %v137_v38  ;;  %v236_v41 = vld [vmem:[%s455_s2] ss:$0 sm:$0xff]  ;;  %s296_s2 = scalar_lea.vmem %s229_s24, 128 }
  0x12   :  { %v240_v49 = vld [vmem:[%s457_s4] ss:$0 sm:$0xff]  ;;  %p297_p0 = scmp.ne.s32.totalorder %s229_s24, %s296_s2  ;;  %p302_p2 = scmp.lt.s32.totalorder %s296_s2, %s296_s2 }
  0x13   :  { %287 = vmatpush3.bf16.msra.mxu1 %v286_v40 }
  0x14   :  { %266 = vmatpush1.bf16.msra.mxu0 %v265_v16  ;;  %p303_p3 = por %p302_p2, %p301_p1 }
  0x15   :  { %267 = vmatprep.subr.bf16.mxu0 %v320_v3 }
  0x16   :  { %p304_p4 = pnand %p303_p3, %p297_p0 }
  0x18   :  { %269 = vmatpush1.bf16.msra.mxu0 %v268_v19 }
  0x19   :  { %270 = vmatprep.subr.bf16.mxu0 %v320_v3 }
  0x1c   :  { %272 = vmatpush1.bf16.msra.mxu0 %v271_v22 }
  0x1d   :  { %273 = vmatprep.subr.bf16.mxu0 %v320_v3 }
  0x20   :  { %275 = vmatpush1.bf16.msra.mxu0 %v274_v25 }
  0x21   :  { %276 = vmatprep.subr.bf16.mxu0 %v320_v3 }
  0x24   :  { %278 = vmatpush1.bf16.msra.mxu0 %v277_v28 }
  0x25   :  { %279 = vmatprep.subr.bf16.mxu0 %v320_v3 }
  0x28   :  { %281 = vmatpush1.bf16.msra.mxu0 %v280_v31 }
  0x29   :  { %282 = vmatprep.subr.bf16.mxu0 %v320_v3 }
  0x2c   :  { %284 = vmatpush1.bf16.msra.mxu0 %v283_v34 }
  0x2d   :  { %105 = vmatprep.subr.mxu0 %v321_v35 }
  0x30   :  { %237 = vmatpush1.msk.msra.mxu0 %vm57_vm1, %v45_v36 }
  0x31   :  { %126 = vmatmul.mubr.f32.vlgmr.msra.gmra.mrb[0].mxu0 %v21_v37 }
 0x104   :  { %v127_v42 = vpop.f32.mrb[0].mxu0 }
 0x105   :  { %v128_v43 = vadd.f32 %v236_v41, %v127_v42  ;;  %v129_v44 = vpop.f32.mrb[1].mxu0 }
 0x107   :  { %v239_v45 = vmul.f32 -1.442695, %v128_v43 }
 0x109   :  { %292 = vpow2.f32 %v239_v45 }
 0x113   :  { %v293_v46 = vpop.eup %292 }
 0x114   :  { %v134_v47 = vadd.f32 1.0, %v293_v46 }
 0x116   :  { %294 = vrcp.f32 %v134_v47 }
 0x120   :  { %v295_v48 = vpop.eup %294 }
 0x121   :  { %250 = vmatmul.mubr.msk.f32.vlgmr.msra.gmra.mrb[0].mxu1 %vm146_vm3, %v295_v48 }
 0x1f4   :  { %v216_v50 = vpop.f32.mrb[0].mxu1 }
 0x1f5   :  { %v217_v51 = vadd.f32 %v240_v49, %v216_v50  ;;  %v251_v52 = vpop.f32.mrb[1].mxu1 }
 0x1f7   :  { %221 = vst.msk [vmem:[#allocation2] sm:$0xff] %vm220_vm4, %v217_v51 }
 0x1f8   :  { %307 = shalt.err (!%p304_p4)
}
 0x1f9   :  { %s308_s27 = scalar_lea.hbm %s458_s5, 128 }
 0x1fa   :  { %p309_p5 = scmp.ne.s32.totalorder %s458_s5, %s308_s27  ;;  %p312_p6 = scmp.lt.u32.totalorder %s308_s27, %s458_s5 }
 0x1fc   :  { %p314_p7 = pnand %p312_p6, %p309_p5 }
 0x1fe   :  { %317 = shalt.err (!%p314_p7)
}
 0x1ff   :  { %231 = dma.vmem_to_hbm [thread:$0]  %s229_s24, 128, %s458_s5, [#allocation3]  }
 0x200   :  { %318 = dma.done.wait [#allocation3], 128  }
 0x201   :  { %319 = vsyncadd [#allocation3], 4294967168 }
 0x202   :  { %235 = vsyncpa [#allocation3], 1 }

</bundles_post_ra>
